<compile_context>
chip_gen: v5e
topology: v5e:2x2
jax: 0.10.0
libtpu: 0.0.40
codegen_flags: <defaults>
</compile_context>

<pallas_src>
import jax
import jax.numpy as jnp
from jax.experimental import pallas as pl
from jax.experimental.pallas import tpu as pltpu


def _round_up(x: int, m: int) -> int:
    return ((x + m - 1) // m) * m


def _vmem_limit_bytes() -> int:
    """Tighter scoped-VMEM limit on 64 MiB parts (v7x), larger on 128 MiB (v5e/v6e)."""
    try:
        cap = int(getattr(pltpu.get_tpu_info(), "vmem_capacity_bytes", 128 << 20))
    except Exception:
        cap = 128 << 20
    return (32 << 20) if cap <= (64 << 20) else (64 << 20)


def _make_fused_kernel(tn, c, k_out, meta, n_true, n_x):
    """meta: static tuple per non-exception key: (t1_ref_idx, w1, is_int_target, t2_ref_idx, w2).
       n_x: number of x-tensor refs passed after pred_y / main_y."""

    def kernel(*refs):
        py_ref, my_ref = refs[0], refs[1]
        x_refs = refs[2:2 + n_x]
        ce_num_ref, ce_cnt_ref, mse_ref = refs[2 + n_x:2 + n_x + 3]

        # ---- row-validity mask for the ragged last tile (no HBM padding anywhere) ----
        rows = pl.program_id(0) * tn + jax.lax.broadcasted_iota(jnp.int32, (tn, 1), 0)
        valid = rows < n_true                                   # [TN, 1] bool

        # ---- class-conditional soft-target cross entropy (per-tile SUM partials) ----
        # Garbage rows past N are zeroed BEFORE any math so no NaN/Inf can leak in.
        logits = jnp.where(valid, py_ref[...].astype(jnp.float32), 0.0)   # [TN, C]
        y = jnp.where(valid, my_ref[...].astype(jnp.float32), 0.0)        # [TN, C]

        m = jnp.max(logits, axis=-1, keepdims=True)             # stable log-softmax
        z = logits - m
        lse = jnp.log(jnp.sum(jnp.exp(z), axis=-1, keepdims=True))
        logp = z - lse                                           # [TN, C]

        row_ce = -jnp.sum(y * logp, axis=-1, keepdims=True)     # [TN, 1] soft-target CE/row
        mask = (y != 0.0).astype(jnp.float32)                   # [TN, C]; zero on invalid rows

        ce_num_ref[...] = jnp.sum(mask * row_ce, axis=0, keepdims=True).reshape(1, 1, c)
        ce_cnt_ref[...] = jnp.sum(mask, axis=0, keepdims=True).reshape(1, 1, c)

        # ---- per-key MSE-of-row-means partial sums (full-ref reductions, no slicing) ----
        acc = jnp.zeros((1, k_out), jnp.float32)
        if meta:
            lane = jax.lax.broadcasted_iota(jnp.int32, (1, k_out), 1)
            for idx, (i1, w1, is_int, i2, w2) in enumerate(meta):
                t1 = x_refs[i1][...].astype(jnp.float32)         # [TN, W1]
                m1 = jnp.sum(t1, axis=-1, keepdims=True) * (1.0 / w1)
                if is_int:
                    # mean(one_hot(t2, w1), dim=1) == 1/w1 per row; one-hot never built.
                    m2 = jnp.float32(1.0 / w1)
                else:
                    t2 = x_refs[i2][...].astype(jnp.float32)     # [TN, W2]
                    m2 = jnp.sum(t2, axis=-1, keepdims=True) * (1.0 / w2)
                d = jnp.where(valid, m1 - m2, 0.0)               # select: garbage rows -> 0
                acc = acc + jnp.where(lane == idx, jnp.sum(d * d), 0.0)
        mse_ref[...] = acc.reshape(1, 1, k_out)

    return kernel


def multiclass_hetero_loss2(pred_y, main_y, pred_x_dict, main_x_dict,
                            exception_keys, enc_factor=0.0):
    """pred_y [N, C] float logits, main_y [N, C] float multi-/one-hot (soft) targets."""
    n, c = pred_y.shape
    keys = [k for k in pred_x_dict.keys() if k not in exception_keys]

    # Per-tensor input streams: no concatenate, no pad -> no duplicated HBM traffic.
    x_inputs, meta = [], []
    for k in keys:
        t1 = pred_x_dict[k]
        t2 = main_x_dict[k]
        w1 = t1.shape[1]
        i1 = len(x_inputs)
        x_inputs.append(t1)
        if t2.ndim == 1 and jnp.issubdtype(t2.dtype, jnp.integer):
            # TODO(synk): torch F.one_hot raises on out-of-range class indices; here indices
            # are assumed valid (the row mean of the one-hot is 1/w1 either way).
            meta.append((i1, w1, True, -1, w1))
        else:
            i2 = len(x_inputs)
            x_inputs.append(t2)
            meta.append((i1, w1, False, i2, t2.shape[1]))

    k_out = max(len(keys), 1)
    n_x = len(x_inputs)

    # ---- tile sizing: byte-sized blocks (~4 MiB/step), keep >=2 grid steps for v7x ----
    bytes_per_row = pred_y.dtype.itemsize * c + main_y.dtype.itemsize * c
    for t in x_inputs:
        bytes_per_row += t.dtype.itemsize * t.shape[1]
    target_block_bytes = 4 << 20                       # ~8 MiB double-buffered, fits all gens
    tn = target_block_bytes // max(1, bytes_per_row)
    tn = min(tn, _round_up((n + 1) // 2, 8))           # grid >= 2 steps (2 TCs on v7x)
    tn = max(8, (tn // 8) * 8)
    grid = (n + tn - 1) // tn                          # ragged last tile handled in-kernel

    kernel = _make_fused_kernel(tn, c, k_out, tuple(meta), n, n_x)

    in_specs = [pl.BlockSpec((tn, c), lambda g: (g, 0)),
                pl.BlockSpec((tn, c), lambda g: (g, 0))]
    for t in x_inputs:
        in_specs.append(pl.BlockSpec((tn, t.shape[1]), lambda g: (g, 0)))

    s_total = sum(t.shape[1] for t in x_inputs)
    out_bytes = grid * (2 * c + k_out) * 4
    cost = pl.CostEstimate(
        flops=int(grid * tn * (8 * c + s_total + 8 * k_out)),
        transcendentals=int(grid * tn * c),
        bytes_accessed=int(pred_y.nbytes + main_y.nbytes
                           + sum(int(t.nbytes) for t in x_inputs) + out_bytes),
    )

    ce_num, ce_cnt, mse_part = pl.pallas_call(
        kernel,
        out_shape=(
            jax.ShapeDtypeStruct((grid, 1, c), jnp.float32),
            jax.ShapeDtypeStruct((grid, 1, c), jnp.float32),
            jax.ShapeDtypeStruct((grid, 1, k_out), jnp.float32),
        ),
        grid_spec=pltpu.PrefetchScalarGridSpec(
            num_scalar_prefetch=0,
            grid=(grid,),
            in_specs=in_specs,
            out_specs=(
                pl.BlockSpec((1, 1, c), lambda g: (g, 0, 0)),
                pl.BlockSpec((1, 1, c), lambda g: (g, 0, 0)),
                pl.BlockSpec((1, 1, k_out), lambda g: (g, 0, 0)),
            ),
        ),
        compiler_params=pltpu.CompilerParams(
            dimension_semantics=("parallel",),
            vmem_limit_bytes=_vmem_limit_bytes(),
        ),
        cost_estimate=cost,
    )(pred_y, main_y, *x_inputs)

    # Tiny wrapper-side reductions over the per-tile partials (keeps the grid 'parallel').
    num_tot = jnp.sum(ce_num, axis=(0, 1))             # [C]
    cnt_tot = jnp.sum(ce_cnt, axis=(0, 1))             # [C]
    # NOTE: a class with no nonzero-target rows yields NaN here, matching PyTorch's
    # CrossEntropyLoss 'mean' over an empty selection.
    loss = jnp.sum(num_tot / cnt_tot)                  # sum over classes of per-class mean CE

    if keys:
        mse_tot = jnp.sum(mse_part, axis=(0, 1))[:len(keys)]   # [K]
        loss = loss + enc_factor * jnp.sum(mse_tot) / n
    return loss


# ---------------------------------------------------------------------------
# Pure-JAX reference (sanity check, mirrors the PyTorch forward).
# ---------------------------------------------------------------------------
def _reference(pred_y, main_y, pred_x_dict, main_x_dict, exception_keys, enc_factor):
    logp = jax.nn.log_softmax(pred_y.astype(jnp.float32), axis=-1)
    y = main_y.astype(jnp.float32)
    row_ce = -jnp.sum(y * logp, axis=-1)
    loss = jnp.float32(0.0)
    for i in range(main_y.shape[1]):
        msk = y[:, i] != 0
        cnt = jnp.sum(msk.astype(jnp.float32))
        loss = loss + jnp.sum(jnp.where(msk, row_ce, 0.0)) / cnt
    for key in pred_x_dict:
        if key in exception_keys:
            continue
        t1 = pred_x_dict[key]
        t2 = main_x_dict[key]
        if t2.ndim == 1 and jnp.issubdtype(t2.dtype, jnp.integer):
            t2 = jax.nn.one_hot(t2.astype(jnp.int32), t1.shape[1], dtype=jnp.float32)
        m1 = jnp.mean(t1.astype(jnp.float32), axis=1)
        m2 = jnp.mean(t2.astype(jnp.float32), axis=1)
        loss = loss + enc_factor * jnp.mean((m1 - m2) ** 2)
    return loss


if __name__ == "__main__":
    key = jax.random.PRNGKey(0)
    k1, k2, k3, k4, k5, k6 = jax.random.split(key, 6)

    N, C = 40, 16          # N chosen to exercise the ragged (masked) last tile
    D_A, D_B = 32, 8       # feature widths of x_dict entries

    # CE head: logits, and a float one-hot target matrix (every class occupied so that
    # no per-class selection is empty, matching well-posed use of the PyTorch module).
    pred_y = jax.random.normal(k1, (N, C), dtype=jnp.float32)
    classes = jnp.arange(N, dtype=jnp.int32) % C
    main_y = jax.nn.one_hot(classes, C, dtype=jnp.float32)

    # x_dict: "a" float/float, "b" float vs 1-D integer (-> one-hot branch),
    # "skip" is listed in exception_keys and must be ignored.
    pred_x_dict = {
        "a": jax.random.normal(k3, (N, D_A), dtype=jnp.float32),
        "b": jax.random.normal(k4, (N, D_B), dtype=jnp.float32),
        "skip": jax.random.normal(k5, (N, D_A), dtype=jnp.float32),
    }
    main_x_dict = {
        "a": jax.random.normal(k6, (N, D_A), dtype=jnp.float32),
        "b": jax.random.randint(k2, (N,), 0, D_B, dtype=jnp.int32),
        "skip": jnp.zeros((N, D_A), dtype=jnp.float32),
    }

    exception_keys = ["skip"]
    enc_factor = 0.5

    loss = multiclass_hetero_loss2(pred_y, main_y, pred_x_dict, main_x_dict,
                                   exception_keys, enc_factor)
    loss = jax.block_until_ready(loss)

    ref = _reference(pred_y, main_y, pred_x_dict, main_x_dict,
                     exception_keys, enc_factor)
    assert jnp.allclose(loss, ref, rtol=1e-5, atol=1e-5), (loss, ref)

    print("KERNEL_OK")
</pallas_src>

<mosaic_0001>
module attributes {stable_mosaic.version = 11 : i64} {
  func.func @kernel(%arg0: i32, %arg1: memref<24x16xf32, #tpu.memory_space<vmem>>, %arg2: memref<24x16xf32, #tpu.memory_space<vmem>>, %arg3: memref<24x32xf32, #tpu.memory_space<vmem>>, %arg4: memref<24x32xf32, #tpu.memory_space<vmem>>, %arg5: memref<24x8xf32, #tpu.memory_space<vmem>>, %arg6: memref<1x1x16xf32, #tpu.memory_space<vmem>>, %arg7: memref<1x1x16xf32, #tpu.memory_space<vmem>>, %arg8: memref<1x1x2xf32, #tpu.memory_space<vmem>>) attributes {dimension_semantics = [#tpu.dimension_semantics<parallel>], iteration_bounds = array<i64: 2>, scalar_prefetch = 0 : i64, scratch_operands = 0 : i64, tpu.core_type = #tpu.core_type<tc>, window_params = [{transform_indices = @transform_0, window_bounds = array<i64: 24, 16>}, {transform_indices = @transform_1, window_bounds = array<i64: 24, 16>}, {transform_indices = @transform_2, window_bounds = array<i64: 24, 32>}, {transform_indices = @transform_3, window_bounds = array<i64: 24, 32>}, {transform_indices = @transform_4, window_bounds = array<i64: 24, 8>}, {transform_indices = @transform_5, window_bounds = array<i64: 1, 1, 16>}, {transform_indices = @transform_6, window_bounds = array<i64: 1, 1, 16>}, {transform_indices = @transform_7, window_bounds = array<i64: 1, 1, 2>}]} {
    %c24_i32 = arith.constant 24 : i32
    %0 = arith.muli %arg0, %c24_i32 : i32
    %1 = tpu.iota {dimensions = array<i32: 0>} : vector<24x1xi32>
    %2 = vector.broadcast %0 : i32 to vector<24x1xi32>
    %3 = arith.addi %2, %1 : vector<24x1xi32>
    %c40_i32 = arith.constant 40 : i32
    %4 = vector.broadcast %c40_i32 : i32 to vector<24x1xi32>
    %5 = arith.cmpi slt, %3, %4 : vector<24x1xi32>
    %c0 = arith.constant 0 : index
    %c0_0 = arith.constant 0 : index
    %6 = vector.load %arg1[%c0, %c0_0] : memref<24x16xf32, #tpu.memory_space<vmem>>, vector<24x16xf32>
    %cst = arith.constant 0.000000e+00 : f32
    %7 = vector.shape_cast %5 : vector<24x1xi1> to vector<24x1xi1>
    %8 = vector.broadcast %7 : vector<24x1xi1> to vector<24x16xi1>
    %9 = vector.broadcast %cst : f32 to vector<24x16xf32>
    %10 = arith.select %8, %6, %9 : vector<24x16xi1>, vector<24x16xf32>
    %c0_1 = arith.constant 0 : index
    %c0_2 = arith.constant 0 : index
    %11 = vector.load %arg2[%c0_1, %c0_2] : memref<24x16xf32, #tpu.memory_space<vmem>>, vector<24x16xf32>
    %cst_3 = arith.constant 0.000000e+00 : f32
    %12 = vector.shape_cast %5 : vector<24x1xi1> to vector<24x1xi1>
    %13 = vector.broadcast %12 : vector<24x1xi1> to vector<24x16xi1>
    %14 = vector.broadcast %cst_3 : f32 to vector<24x16xf32>
    %15 = arith.select %13, %11, %14 : vector<24x16xi1>, vector<24x16xf32>
    %cst_4 = arith.constant dense<0xFF800000> : vector<24xf32>
    %16 = vector.multi_reduction <maximumf>, %10, %cst_4 [1] : vector<24x16xf32> to vector<24xf32>
    %17 = vector.shape_cast %16 : vector<24xf32> to vector<24x1xf32>
    %18 = vector.broadcast %17 : vector<24x1xf32> to vector<24x16xf32>
    %19 = arith.subf %10, %18 : vector<24x16xf32>
    %20 = math.exp %19 : vector<24x16xf32>
    %cst_5 = arith.constant dense<0.000000e+00> : vector<24xf32>
    %21 = vector.multi_reduction <add>, %20, %cst_5 [1] : vector<24x16xf32> to vector<24xf32>
    %22 = vector.shape_cast %21 : vector<24xf32> to vector<24x1xf32>
    %23 = math.log %22 : vector<24x1xf32>
    %24 = vector.broadcast %23 : vector<24x1xf32> to vector<24x16xf32>
    %25 = arith.subf %19, %24 : vector<24x16xf32>
    %26 = arith.mulf %15, %25 : vector<24x16xf32>
    %cst_6 = arith.constant dense<0.000000e+00> : vector<24xf32>
    %27 = vector.multi_reduction <add>, %26, %cst_6 [1] : vector<24x16xf32> to vector<24xf32>
    %28 = vector.shape_cast %27 : vector<24xf32> to vector<24x1xf32>
    %cst_7 = arith.constant 0.000000e+00 : f32
    %29 = vector.broadcast %cst_7 : f32 to vector<24x1xf32>
    %30 = arith.subf %29, %28 : vector<24x1xf32>
    %cst_8 = arith.constant 0.000000e+00 : f32
    %31 = vector.broadcast %cst_8 : f32 to vector<24x16xf32>
    %32 = arith.cmpf one, %15, %31 : vector<24x16xf32>
    %33 = arith.extui %32 : vector<24x16xi1> to vector<24x16xi32>
    %34 = arith.sitofp %33 : vector<24x16xi32> to vector<24x16xf32>
    %35 = vector.broadcast %30 : vector<24x1xf32> to vector<24x16xf32>
    %36 = arith.mulf %34, %35 : vector<24x16xf32>
    %cst_9 = arith.constant dense<0.000000e+00> : vector<16xf32>
    %37 = vector.multi_reduction <add>, %36, %cst_9 [0] : vector<24x16xf32> to vector<16xf32>
    %38 = vector.shape_cast %37 : vector<16xf32> to vector<1x16xf32>
    %39 = vector.shape_cast %38 : vector<1x16xf32> to vector<1x1x16xf32>
    %c0_10 = arith.constant 0 : index
    %c0_11 = arith.constant 0 : index
    %c0_12 = arith.constant 0 : index
    %40 = vector.load %arg6[%c0_10, %c0_11, %c0_12] : memref<1x1x16xf32, #tpu.memory_space<vmem>>, vector<1x1x16xf32>
    tpu.vector_store %arg6[%c0_10, %c0_11, %c0_12], %39 {strides = array<i32>} : memref<1x1x16xf32, #tpu.memory_space<vmem>>, vector<1x1x16xf32>,
    %cst_13 = arith.constant dense<0.000000e+00> : vector<16xf32>
    %41 = vector.multi_reduction <add>, %34, %cst_13 [0] : vector<24x16xf32> to vector<16xf32>
    %42 = vector.shape_cast %41 : vector<16xf32> to vector<1x16xf32>
    %43 = vector.shape_cast %42 : vector<1x16xf32> to vector<1x1x16xf32>
    %c0_14 = arith.constant 0 : index
    %c0_15 = arith.constant 0 : index
    %c0_16 = arith.constant 0 : index
    %44 = vector.load %arg7[%c0_14, %c0_15, %c0_16] : memref<1x1x16xf32, #tpu.memory_space<vmem>>, vector<1x1x16xf32>
    tpu.vector_store %arg7[%c0_14, %c0_15, %c0_16], %43 {strides = array<i32>} : memref<1x1x16xf32, #tpu.memory_space<vmem>>, vector<1x1x16xf32>,
    %cst_17 = arith.constant 0.000000e+00 : f32
    %45 = vector.broadcast %cst_17 : f32 to vector<1x2xf32>
    %46 = tpu.iota {dimensions = array<i32: 1>} : vector<1x2xi32>
    %c0_18 = arith.constant 0 : index
    %c0_19 = arith.constant 0 : index
    %47 = vector.load %arg3[%c0_18, %c0_19] : memref<24x32xf32, #tpu.memory_space<vmem>>, vector<24x32xf32>
    %cst_20 = arith.constant dense<0.000000e+00> : vector<24xf32>
    %48 = vector.multi_reduction <add>, %47, %cst_20 [1] : vector<24x32xf32> to vector<24xf32>
    %49 = vector.shape_cast %48 : vector<24xf32> to vector<24x1xf32>
    %cst_21 = arith.constant 3.125000e-02 : f32
    %50 = vector.broadcast %cst_21 : f32 to vector<24x1xf32>
    %51 = arith.mulf %49, %50 : vector<24x1xf32>
    %c0_22 = arith.constant 0 : index
    %c0_23 = arith.constant 0 : index
    %52 = vector.load %arg4[%c0_22, %c0_23] : memref<24x32xf32, #tpu.memory_space<vmem>>, vector<24x32xf32>
    %cst_24 = arith.constant dense<0.000000e+00> : vector<24xf32>
    %53 = vector.multi_reduction <add>, %52, %cst_24 [1] : vector<24x32xf32> to vector<24xf32>
    %54 = vector.shape_cast %53 : vector<24xf32> to vector<24x1xf32>
    %cst_25 = arith.constant 3.125000e-02 : f32
    %55 = vector.broadcast %cst_25 : f32 to vector<24x1xf32>
    %56 = arith.mulf %54, %55 : vector<24x1xf32>
    %57 = arith.subf %51, %56 : vector<24x1xf32>
    %cst_26 = arith.constant 0.000000e+00 : f32
    %58 = vector.broadcast %cst_26 : f32 to vector<24x1xf32>
    %59 = arith.select %5, %57, %58 : vector<24x1xi1>, vector<24x1xf32>
    %c0_i32 = arith.constant 0 : i32
    %60 = vector.broadcast %c0_i32 : i32 to vector<1x2xi32>
    %61 = arith.cmpi eq, %46, %60 : vector<1x2xi32>
    %62 = arith.mulf %59, %59 : vector<24x1xf32>
    %63 = vector.shape_cast %62 : vector<24x1xf32> to vector<1x24x1xf32>
    %cst_27 = arith.constant dense<0.000000e+00> : vector<1xf32>
    %64 = vector.multi_reduction <add>, %63, %cst_27 [1, 2] : vector<1x24x1xf32> to vector<1xf32>
    %65 = vector.shape_cast %64 : vector<1xf32> to vector<1x1x1xf32>
    %66 = vector.extract %65[0, 0, 0] : f32 from vector<1x1x1xf32>
    %cst_28 = arith.constant 0.000000e+00 : f32
    %67 = vector.broadcast %66 : f32 to vector<1x2xf32>
    %68 = vector.broadcast %cst_28 : f32 to vector<1x2xf32>
    %69 = arith.select %61, %67, %68 : vector<1x2xi1>, vector<1x2xf32>
    %70 = arith.addf %45, %69 : vector<1x2xf32>
    %c0_29 = arith.constant 0 : index
    %c0_30 = arith.constant 0 : index
    %71 = vector.load %arg5[%c0_29, %c0_30] : memref<24x8xf32, #tpu.memory_space<vmem>>, vector<24x8xf32>
    %cst_31 = arith.constant dense<0.000000e+00> : vector<24xf32>
    %72 = vector.multi_reduction <add>, %71, %cst_31 [1] : vector<24x8xf32> to vector<24xf32>
    %73 = vector.shape_cast %72 : vector<24xf32> to vector<24x1xf32>
    %cst_32 = arith.constant 1.250000e-01 : f32
    %74 = vector.broadcast %cst_32 : f32 to vector<24x1xf32>
    %75 = arith.mulf %73, %74 : vector<24x1xf32>
    %cst_33 = arith.constant 1.250000e-01 : f32
    %76 = vector.broadcast %cst_33 : f32 to vector<24x1xf32>
    %77 = arith.subf %75, %76 : vector<24x1xf32>
    %cst_34 = arith.constant 0.000000e+00 : f32
    %78 = vector.broadcast %cst_34 : f32 to vector<24x1xf32>
    %79 = arith.select %5, %77, %78 : vector<24x1xi1>, vector<24x1xf32>
    %c1_i32 = arith.constant 1 : i32
    %80 = vector.broadcast %c1_i32 : i32 to vector<1x2xi32>
    %81 = arith.cmpi eq, %46, %80 : vector<1x2xi32>
    %82 = arith.mulf %79, %79 : vector<24x1xf32>
    %83 = vector.shape_cast %82 : vector<24x1xf32> to vector<1x24x1xf32>
    %cst_35 = arith.constant dense<0.000000e+00> : vector<1xf32>
    %84 = vector.multi_reduction <add>, %83, %cst_35 [1, 2] : vector<1x24x1xf32> to vector<1xf32>
    %85 = vector.shape_cast %84 : vector<1xf32> to vector<1x1x1xf32>
    %86 = vector.extract %85[0, 0, 0] : f32 from vector<1x1x1xf32>
    %cst_36 = arith.constant 0.000000e+00 : f32
    %87 = vector.broadcast %86 : f32 to vector<1x2xf32>
    %88 = vector.broadcast %cst_36 : f32 to vector<1x2xf32>
    %89 = arith.select %81, %87, %88 : vector<1x2xi1>, vector<1x2xf32>
    %90 = arith.addf %70, %89 : vector<1x2xf32>
    %91 = vector.shape_cast %90 : vector<1x2xf32> to vector<1x1x2xf32>
    %c0_37 = arith.constant 0 : index
    %c0_38 = arith.constant 0 : index
    %c0_39 = arith.constant 0 : index
    %92 = vector.load %arg8[%c0_37, %c0_38, %c0_39] : memref<1x1x2xf32, #tpu.memory_space<vmem>>, vector<1x1x2xf32>
    tpu.vector_store %arg8[%c0_37, %c0_38, %c0_39], %91 {strides = array<i32>} : memref<1x1x2xf32, #tpu.memory_space<vmem>>, vector<1x1x2xf32>,
    return
  }
  func.func @transform_0(%arg0: i32) -> (i32, i32) {
    %c0_i32 = arith.constant 0 : i32
    %c0_i32_0 = arith.constant 0 : i32
    return %arg0, %c0_i32 : i32, i32
  }
  func.func @transform_1(%arg0: i32) -> (i32, i32) {
    %c0_i32 = arith.constant 0 : i32
    %c0_i32_0 = arith.constant 0 : i32
    return %arg0, %c0_i32 : i32, i32
  }
  func.func @transform_2(%arg0: i32) -> (i32, i32) {
    %c0_i32 = arith.constant 0 : i32
    %c0_i32_0 = arith.constant 0 : i32
    return %arg0, %c0_i32 : i32, i32
  }
  func.func @transform_3(%arg0: i32) -> (i32, i32) {
    %c0_i32 = arith.constant 0 : i32
    %c0_i32_0 = arith.constant 0 : i32
    return %arg0, %c0_i32 : i32, i32
  }
  func.func @transform_4(%arg0: i32) -> (i32, i32) {
    %c0_i32 = arith.constant 0 : i32
    %c0_i32_0 = arith.constant 0 : i32
    return %arg0, %c0_i32 : i32, i32
  }
  func.func @transform_5(%arg0: i32) -> (i32, i32, i32) {
    %c0_i32 = arith.constant 0 : i32
    %c0_i32_0 = arith.constant 0 : i32
    %c0_i32_1 = arith.constant 0 : i32
    return %arg0, %c0_i32, %c0_i32_0 : i32, i32, i32
  }
  func.func @transform_6(%arg0: i32) -> (i32, i32, i32) {
    %c0_i32 = arith.constant 0 : i32
    %c0_i32_0 = arith.constant 0 : i32
    %c0_i32_1 = arith.constant 0 : i32
    return %arg0, %c0_i32, %c0_i32_0 : i32, i32, i32
  }
  func.func @transform_7(%arg0: i32) -> (i32, i32, i32) {
    %c0_i32 = arith.constant 0 : i32
    %c0_i32_0 = arith.constant 0 : i32
    %c0_i32_1 = arith.constant 0 : i32
    return %arg0, %c0_i32, %c0_i32_0 : i32, i32, i32
  }
}

</mosaic_0001>

<bundles_post_ra>
// kernel: tpu_custom_call.1
= control target key start
LH: loop header
LB: loop body
LE: loop exit
PB: predicated region body
PF: predicated region fallthrough
CT: control target
= control target key end

     0   :  { %s1399_s0 = inlined_call_operand.vmem [shape: f32[40,16], index: 0, kind: input, shape index: {}]   ;;  %s1400_s1 = inlined_call_operand.vmem [shape: f32[40,16], index: 1, kind: input, shape index: {}]   ;;  %s1401_s2 = inlined_call_operand.vmem [shape: f32[40,32], index: 2, kind: input, shape index: {}]   ;;  %s1402_s3 = inlined_call_operand.vmem [shape: f32[40,32], index: 3, kind: input, shape index: {}]   ;;  %s1403_s4 = inlined_call_operand.vmem [shape: f32[40,8], index: 4, kind: input, shape index: {}]   ;;  %s1404_s5 = inlined_call_operand.hbm [shape: f32[2,1,16], index: 5, kind: output, shape index: {0}]   ;;  %s1405_s6 = inlined_call_operand.hbm [shape: f32[2,1,16], index: 6, kind: output, shape index: {1}]   ;;  %s1406_s7 = inlined_call_operand.hbm [shape: f32[2,1,2], index: 7, kind: output, shape index: {2}]  }
   0x1   :  { %1408 = sst [smem:[#allocation9_spill]] %s1399_s0 }
   0x2   :  { %13 = vsyncpa [#allocation3], 0 }
   0x3   :  { %15 = vsyncpa [#allocation3 + $0x1], 0 }
   0x4   :  { %16 = vsyncpa [#allocation5], 0 }
   0x5   :  { %18 = vsyncpa [#allocation5 + $0x1], 0  ;;  %s1158_s24 = smov 0   ;;  %s1160_s25 = smov 0  }
   0x6   :  { %s1162_s26 = smov 0   ;;  %s1164_s27 = smov 0  }
   0x7 LB: > { %s1179_s28 = sadd.s32 4294967295, %s1115_s27   ;;  %s1407_s29 = sadd.s32 4294967294, %s1115_s27   ;;  %s1115_s27 = sphi %s1164_s27, %s1416_s27   ;;  %s1111_s26 = sphi %s1162_s26, %s1415_s26   ;;  %s1107_s25 = sphi %s1160_s25, %s1414_s25   ;;  %s1103_s24 = sphi %s1158_s24, %s1413_s24  }
   0x8   : > { %s1183_s30 = sadd.s32 1, %s1115_s27   ;;  %s161_s8 = sadd.s32 1, %s1111_s26 }
   0x9   : > { %s158_s9 = ssub.s32 %s1115_s27, %s1183_s30  ;;  %p171_p0 = scmp.ne.s32.totalorder %s1111_s26, %s1107_s25 }
   0xa   : > { %p159_p1 = scmp.eq.s32.totalorder %s158_s9, 0  ;;  %p172_p2 = scmp.eq.s32.totalorder %s1179_s28, 1 }
   0xb   : > { %p177_p3 = scmp.ne.s32.totalorder %s1107_s25, %s1103_s24  ;;  %p178_p4 = scmp.eq.s32.totalorder %s1407_s29, 1 }
   0xc   : > { %s1196_s10 = scalar_select %p159_p1, %s1111_s26, %s161_s8  }
   0xd   : > { %p1198_p5 = por %p172_p2, %p171_p0  ;;  %p1202_p6 = por %p178_p4, %p177_p3 }
   0xe   : > { %p913_p7 = scmp.ge.s32.totalorder %s1115_s27, 1  ;;  %p333_p8 = scmp.lt.s32.totalorder %s1115_s27, 3 }
  0x10   : > { %p334_p9 = pnand %p913_p7, %p333_p8 }
  0x11   : > { %s412_s13 = smul.u32 (!%p334_p9), 3, %s1179_s28  ;;  %s1411_s0 = sld [smem:[#allocation9_spill]] (!%p334_p9) }
  0x12   : > { %337 = sbr.rel (%p334_p9) target bundleno = 438 (0x1b6), region = 40  ;;  %s1311_s19 = sand.u32 (!%p334_p9), 1, %s1107_s25  }
  0x13   : > { %s482_s14 = smul.u32 (!%p334_p9), 24, %s1179_s28  ;;  %p417_p10 = scmp.lt.s32.totalorder (!%p334_p9), %s412_s13, 4 }
  0x14   : > { %s711_s16 = sand.u32 (!%p334_p9), 1, %s1179_s28   ;;  %s405_s17 = scalar_lea.vmem (!%p334_p9), [#allocation4], %s1311_s19 }
  0x15   : > { %s712_s22 = scalar_lea.sflag (!%p334_p9), [#allocation5], %s711_s16 }
  0x17   : > { %v483_v0 = vlaneseq  ;;  %v487_v2 = vstv %s482_s14  ;;  %s1418_s13 = smov (!%p417_p10, %s412_s13), 4  ;;  %vm606_vm0 = vcmask 261120   ;;  %vm512_vm2 = vcmask 130048  }
  0x18   : > { %s1213_s15 = sshll.u32 %s1418_s13, 3  ;;  %vm665_vm5 = vcmask 64512   ;;  %vm644_vm6 = vcmask 7168   ;;  %vm705_vm9 = vcmask 8192   ;;  %vm587_vm13 = vcmask 122880   ;;  %s1013_s13 = scalar_lea.hbm %s1405_s6, 2 }
  0x19   : > { %v484_v1 = vshrl.u32 %v483_v0, 7  ;;  %s1224_s18 = scalar_lea.vmem %s1401_s2, %s1213_s15  ;;  %s420_s21 = scalar_lea.vmem %s1411_s0, %s1213_s15 }
  0x1a   : > { %v604_v8 = vld [vmem:[%s1224_s18 + $0x8] sm:$0xff]  ;;  %v603_v9 = vld [vmem:[%s1224_s18] sm:$0xff]  ;;  %s1240_s8 = scalar_lea.vmem %s1402_s3, %s1213_s15  ;;  %v496_v14 = vld [vmem:[%s420_s21 + $0x10] sm:$0xff]  ;;  %s476_s14 = scalar_lea.vmem %s1403_s4, %s1213_s15 }
  0x1b   : > { %v1211_v3 = vadd.s32 %v487_v2, %v484_v1  ;;  %v486_v4 = vadd.s32 16, %v484_v1  ;;  %v485_v5 = vadd.s32 8, %v484_v1  ;;  %v494_v10 = vld [vmem:[%s420_s21] sm:$0xff]  ;;  %v610_v11 = vsel %vm606_vm0, %v604_v8, 0.0  ;;  %v495_v16 = vld [vmem:[%s420_s21 + $0x8] sm:$0xff]  ;;  %v664_v29 = vld [vmem:[%s476_s14 + $0x10] sm:$0xff] }
  0x1c   : > { %v607_v12 = vsel %vm606_vm0, %v603_v9, 0.0  ;;  %611 = vadd.xlane.f32.xlu2 %v610_v11  ;;  %v619_v17 = vld [vmem:[%s1240_s8] sm:$0xff]  ;;  %v663_v23 = vld [vmem:[%s476_s14 + $0x8] sm:$0xff]  ;;  %v621_v30 = vld [vmem:[%s1240_s8 + $0x10] sm:$0xff]  ;;  %v672_v32 = vsel %vm665_vm5, %v664_v29, 0.0  ;;  %s411_s21 = scalar_lea.vmem [#allocation6], %s1311_s19 }
  0x1d   : > { %vm491_vm1 = vcmp.lt.s32.totalorder %v1211_v3, 40  ;;  %v1216_v6 = vadd.s32 %v487_v2, %v486_v4  ;;  %v1218_v7 = vadd.s32 %v487_v2, %v485_v5  ;;  %608 = vadd.xlane.f32.xlu1 %v607_v12  ;;  %v622_v20 = vsel %vm606_vm0, %v619_v17, 0.0  ;;  %v662_v24 = vld [vmem:[%s476_s14] sm:$0xff]  ;;  %v620_v25 = vld [vmem:[%s1240_s8 + $0x8] sm:$0xff]  ;;  %v605_v31 = vld [vmem:[%s1224_s18 + $0x10] sm:$0xff]  ;;  %s434_s18 = scalar_lea.vmem %s1400_s1, %s1213_s15  ;;  %s737_s8 = scalar_lea.hbm %s1405_s6, %s1179_s28 }
  0x1e   : > { %v503_v13 = vsel %vm491_vm1, %v494_v10, 0.0  ;;  %v669_v26 = vsel %vm665_vm5, %v663_v23, 0.0  ;;  %v666_v27 = vsel %vm665_vm5, %v662_v24, 0.0  ;;  %v625_v28 = vsel %vm606_vm0, %v620_v25, 0.0  ;;  %s750_s14 = scalar_lea.hbm %s1406_s7, %s1179_s28 }
  0x1f   : > { %vm493_vm3 = vcmp.lt.s32.totalorder %v1216_v6, 40  ;;  %v513_v15 = vsel %vm512_vm2, %v503_v13, -inf  ;;  %vm492_vm4 = vcmp.lt.s32.totalorder %v1218_v7, 40  ;;  %v628_v33 = vsel %vm606_vm0, %v621_v30, 0.0  ;;  %s1329_s29 = sshll.u32 %s750_s14, 4  ;;  %s755_s29 = int_to_ptr.hbm [resolvable:$true] %s1329_s29 }
  0x20   : > { %514 = vmax.xlane.f32.xlu0 %v513_v15  ;;  %v505_v18 = vsel %vm493_vm3, %v496_v14, 0.0  ;;  %v504_v19 = vsel %vm492_vm4, %v495_v16, 0.0  ;;  %v613_v34 = vsel %vm606_vm0, %v605_v31, 0.0 }
  0x21   : > { %v519_v21 = vsel %vm512_vm2, %v505_v18, -inf  ;;  %v516_v22 = vsel %vm512_vm2, %v504_v19, -inf }
  0x24   : > { %623 = vadd.xlane.f32.xlu2 %v622_v20 }
  0x25   : > { %520 = vmax.xlane.f32.xlu1 %v519_v21 }
  0x28   : > { %517 = vmax.xlane.f32.xlu0 %v516_v22 }
  0x2c   : > { %670 = vadd.xlane.f32.xlu2 %v669_v26 }
  0x2d   : > { %667 = vadd.xlane.f32.xlu1 %v666_v27 }
  0x30   : > { %626 = vadd.xlane.f32.xlu0 %v625_v28 }
  0x34   : > { %673 = vadd.xlane.f32.xlu2 %v672_v32 }
  0x35   : > { %629 = vadd.xlane.f32.xlu1 %v628_v33 }
  0x38   : > { %614 = vadd.xlane.f32.xlu0 %v613_v34 }
  0x8f   : > { %v612_v35 = vpop.xlane.xlu2 %611 }
  0x90   : > { %v609_v36 = vpop.xlane.xlu1 %608  ;;  %v617_v49 = vmul.f32 0.03125, %v612_v35 }
  0x91   : > { %v616_v56 = vmul.f32 0.03125, %v609_v36 }
  0x93   : > { %v515_v37 = vpop.xlane.xlu0 %514 }
  0x94   : > { %v1263_v38 = vsub.f32 %v503_v13, %v515_v37  ;;  %v506_v37 = vld [vmem:[%s434_s18] sm:$0xff] }
  0x96   : > { %v525_v39 = vmul.f32 1.442695, %v1263_v38 }
  0x97   : > { %v624_v40 = vpop.xlane.xlu2 %623 }
  0x98   : > { %981 = vpow2.f32 %v525_v39  ;;  %v521_v41 = vpop.xlane.xlu1 %520  ;;  %v631_v50 = vmul.f32 0.03125, %v624_v40 }
  0x99   : > { %v1266_v42 = vsub.f32 %v505_v18, %v521_v41 }
  0x9a   : > { %v634_v62 = vsub.f32 %v616_v56, %v631_v50 }
  0x9b   : > { %v518_v43 = vpop.xlane.xlu0 %517  ;;  %v529_v45 = vmul.f32 1.442695, %v1266_v42 }
  0x9c   : > { %v1268_v44 = vsub.f32 %v504_v19, %v518_v43  ;;  %v637_v11 = vsel %vm491_vm1, %v634_v62, 0.0 }
  0x9d   : > { %983 = vpow2.f32 %v529_v45  ;;  %v641_v21 = vmul.f32 %v637_v11, %v637_v11  ;;  %v509_v45 = vsel %vm491_vm1, %v506_v37, 0.0  ;;  %v602_v11 = vand.u32 127, %v483_v0 }
  0x9e   : > { %v982_v46 = vpop.eup %981  ;;  %v527_v47 = vmul.f32 1.442695, %v1268_v44  ;;  %vm564_vm10 = vcmp.ne.f32.partialorder %v509_v45, 0.0  ;;  %v1117_v0 = vmov 0.0  }
  0x9f   : > { %v531_v48 = vsel %vm512_vm2, %v982_v46, 0.0  ;;  %v671_v51 = vpop.xlane.xlu2 %670  ;;  %v645_v30 = vsel %vm644_vm6, %v641_v21, 0.0  ;;  %vm640_vm7 = vcmp.eq.s32.totalorder %v602_v11, 0  ;;  %vm684_vm8 = vcmp.eq.s32.totalorder %v602_v11, 1 }
  0xa0   : > { %985 = vpow2.f32 %v527_v47  ;;  %532 = vadd.xlane.f32.xlu0 %v531_v48  ;;  %v668_v52 = vpop.xlane.xlu1 %667  ;;  %v676_v53 = vmul.f32 0.125, %v671_v51  ;;  %v508_v48 = vld [vmem:[%s434_s18 + $0x10] sm:$0xff]  ;;  %v507_v51 = vld [vmem:[%s434_s18 + $0x8] sm:$0xff]  ;;  %s739_s18 = sshll.u32 %s405_s17, 4  ;;  %s740_s18 = int_to_ptr.vmem [resolvable:$true] %s739_s18 }
  0xa1   : > { %v675_v54 = vmul.f32 0.125, %v668_v52  ;;  %v510_v3 = vsel %vm492_vm4, %v507_v51, 0.0 }
  0xa2   : > { %v923_v59 = vadd.f32 -0.125, %v676_v53  ;;  %vm565_vm12 = vcmp.ne.f32.partialorder %v510_v3, 0.0 }
  0xa3   : > { %v627_v55 = vpop.xlane.xlu0 %626  ;;  %v984_v58 = vpop.eup %983  ;;  %v922_v60 = vadd.f32 -0.125, %v675_v54 }
  0xa4   : > { %v632_v57 = vmul.f32 0.03125, %v627_v55  ;;  %v537_v1 = vsel %vm512_vm2, %v984_v58, 0.0  ;;  %v682_v2 = vsel %vm492_vm4, %v923_v59, 0.0  ;;  %v511_v55 = vsel %vm493_vm3, %v508_v48, 0.0 }
  0xa5   : > { %v681_v4 = vsel %vm491_vm1, %v922_v60, 0.0  ;;  %538 = vadd.xlane.f32.xlu2 %v537_v1  ;;  %v686_v8 = vmul.f32 %v682_v2, %v682_v2  ;;  %vm566_vm11 = vcmp.ne.f32.partialorder %v511_v55, 0.0 }
  0xa6   : > { %v986_v61 = vpop.eup %985  ;;  %v635_v63 = vsub.f32 %v617_v49, %v632_v57  ;;  %v685_v9 = vmul.f32 %v681_v4, %v681_v4 }
  0xa7   : > { %v534_v5 = vsel %vm512_vm2, %v986_v61, 0.0  ;;  %v674_v12 = vpop.xlane.xlu2 %673  ;;  %v689_v20 = vsel %vm644_vm6, %v686_v8, 0.0 }
  0xa8   : > { %v638_v10 = vsel %vm492_vm4, %v635_v63, 0.0  ;;  %535 = vadd.xlane.f32.xlu1 %v534_v5  ;;  %v630_v13 = vpop.xlane.xlu1 %629  ;;  %v677_v15 = vmul.f32 0.125, %v674_v12  ;;  %v688_v19 = vsel %vm644_vm6, %v685_v9, 0.0 }
  0xa9   : > { %v642_v14 = vmul.f32 %v638_v10, %v638_v10  ;;  %v633_v16 = vmul.f32 0.03125, %v630_v13  ;;  %v690_v25 = vadd.f32 %v689_v20, %v688_v19  ;;  %v921_v19 = vsel %vm566_vm11, 1.0, %v1117_v0 }
  0xaa   : > { %v924_v22 = vadd.f32 -0.125, %v677_v15  ;;  %v920_v20 = vsel %vm565_vm12, 1.0, %v1117_v0  ;;  %v592_v21 = vsel %vm512_vm2, %v921_v19, 0.0 }
  0xab   : > { %v615_v17 = vpop.xlane.xlu0 %614  ;;  %v646_v26 = vsel %vm644_vm6, %v642_v14, 0.0 }
  0xac   : > { %v618_v18 = vmul.f32 0.03125, %v615_v17  ;;  %v683_v24 = vsel %vm493_vm3, %v924_v22, 0.0  ;;  %v647_v32 = vadd.f32 %v646_v26, %v645_v30  ;;  %v919_v17 = vsel %vm564_vm10, 1.0, %v1117_v0 }
  0xad   : > { %v687_v27 = vmul.f32 %v683_v24, %v683_v24  ;;  %v590_v22 = vsel %vm512_vm2, %v920_v20, 0.0 }
  0xae   : > { %v636_v23 = vsub.f32 %v618_v18, %v633_v16  ;;  %v589_v18 = vsel %vm512_vm2, %v919_v17, 0.0 }
  0xaf   : > { %v691_v31 = vsel %vm644_vm6, %v687_v27, 0.0 }
  0xb0   : > { %v639_v28 = vsel %vm493_vm3, %v636_v23, 0.0  ;;  %v692_v33 = vadd.f32 %v691_v31, %v690_v25  ;;  %v591_v23 = vadd.f32 %v590_v22, %v589_v18 }
  0xb1   : > { %v643_v29 = vmul.f32 %v639_v28, %v639_v28 }
  0xb2   : > { %693 = vadd.xlane.f32.xlu1 %v692_v33  ;;  %v593_v24 = vadd.f32 %v592_v21, %v591_v23 }
  0xb3   : > { %v648_v34 = vsel %vm644_vm6, %v643_v29, 0.0 }
  0xb4   : > { %v649_v35 = vadd.f32 %v648_v34, %v647_v32  ;;  %v594_v25 = vrot.slane %v593_v24, 4 }
  0xb6   : > { %650 = vadd.xlane.f32.xlu0 %v649_v35  ;;  %v595_v26 = vadd.f32 %v594_v25, %v593_v24 }
  0xb8   : > { %v596_v27 = vrot.slane %v595_v26, 2 }
  0xba   : > { %v597_v28 = vadd.f32 %v596_v27, %v595_v26 }
  0xbc   : > { %v598_v29 = vrot.slane %v597_v28, 1 }
  0xbe   : > { %v599_v30 = vadd.f32 %v598_v29, %v597_v28 }
  0xc0   : > { %600 = vst.msk [vmem:[%s405_s17] sm:$0x1] %vm587_vm13, %v599_v30 }
 0x113   : > { %v533_v36 = vpop.xlane.xlu0 %532 }
 0x114   : > { %987 = vlog2.f32 %v533_v36 }
 0x118   : > { %v539_v40 = vpop.xlane.xlu2 %538 }
 0x119   : > { %989 = vlog2.f32 %v539_v40 }
 0x11a   : > { %v988_v39 = vpop.eup %987 }
 0x11b   : > { %v541_v41 = vmul.f32 0.6931472, %v988_v39  ;;  %v536_v43 = vpop.xlane.xlu1 %535 }
 0x11c   : > { %991 = vlog2.f32 %v536_v43 }
 0x11d   : > { %v546_v46 = vsub.f32 %v1263_v38, %v541_v41 }
 0x11f   : > { %v549_v47 = vmul.f32 %v546_v46, %v509_v45  ;;  %v990_v49 = vpop.eup %989 }
 0x120   : > { %v545_v53 = vmul.f32 0.6931472, %v990_v49 }
 0x121   : > { %v552_v50 = vsel %vm512_vm2, %v549_v47, 0.0 }
 0x122   : > { %v992_v52 = vpop.eup %991  ;;  %553 = vadd.xlane.f32.xlu2 %v552_v50  ;;  %v548_v56 = vsub.f32 %v1266_v42, %v545_v53 }
 0x123   : > { %v543_v54 = vmul.f32 0.6931472, %v992_v52 }
 0x124   : > { %v551_v57 = vmul.f32 %v548_v56, %v511_v55 }
 0x125   : > { %v547_v38 = vsub.f32 %v1268_v44, %v543_v54  ;;  %v694_v60 = vpop.xlane.xlu1 %693 }
 0x126   : > { %v558_v59 = vsel %vm512_vm2, %v551_v57, 0.0  ;;  %v695_v61 = vrot.slane %v694_v60, 4 }
 0x127   : > { %v550_v58 = vmul.f32 %v547_v38, %v510_v3  ;;  %559 = vadd.xlane.f32.xlu1 %v558_v59 }
 0x128   : > { %v696_v6 = vadd.f32 %v695_v61, %v694_v60 }
 0x129   : > { %v651_v62 = vpop.xlane.xlu0 %650  ;;  %v555_v63 = vsel %vm512_vm2, %v550_v58, 0.0 }
 0x12a   : > { %v652_v1 = vrot.slane %v651_v62, 4  ;;  %556 = vadd.xlane.f32.xlu0 %v555_v63  ;;  %v697_v2 = vrot.slane %v696_v6, 2 }
 0x12c   : > { %v653_v42 = vadd.f32 %v652_v1, %v651_v62  ;;  %v698_v4 = vadd.f32 %v697_v2, %v696_v6 }
 0x12e   : > { %v654_v7 = vrot.slane %v653_v42, 2  ;;  %v699_v44 = vrot.slane %v698_v4, 1 }
 0x130   : > { %v655_v5 = vadd.f32 %v654_v7, %v653_v42  ;;  %v700_v9 = vadd.f32 %v699_v44, %v698_v4 }
 0x132   : > { %v656_v8 = vrot.slane %v655_v5, 1 }
 0x134   : > { %v657_v10 = vadd.f32 %v656_v8, %v655_v5 }
 0x136   : > { %927 = vpush %v657_v10 }
 0x137   : > { %929 = vpush %v700_v9 }
 0x167   : > { %s928_s15 = spop %927 }
 0x168   : > { %v659_v12 = vstv %s928_s15  ;;  %s930_s20 = spop %929  ;;  %s741_s15 = sshll.u32 %s737_s8, 4  ;;  %s742_s15 = int_to_ptr.hbm [resolvable:$true] %s741_s15 }
 0x169   : > { %v660_v13 = vsel %vm640_vm7, %v659_v12, 0.0  ;;  %v702_v14 = vstv %s930_s20  ;;  %s1327_s20 = sshll.u32 %s411_s21, 4  ;;  %s1007_s23 = sshra.s32 %s742_s15, 4  ;;  %s753_s20 = int_to_ptr.vmem [resolvable:$true] %s1327_s20  ;;  %s1008_s23 = int_to_ptr.hbm [resolvable:$true] %s1007_s23 }
 0x16a   : > { %v703_v15 = vsel %vm684_vm8, %v702_v14, 0.0  ;;  %s1009_s8 = scalar_lea.hbm %s1008_s23, 1  ;;  %p1014_p0 = scmp.lt.s32.totalorder %s1008_s23, %s1405_s6 }
 0x16b   : > { %v704_v16 = vadd.f32 %v703_v15, %v660_v13  ;;  %p1010_p11 = scmp.ne.s32.totalorder %s1008_s23, %s1009_s8  ;;  %p1015_p1 = scmp.lt.s32.totalorder %s1013_s13, %s1009_s8 }
 0x16d   : > { %706 = vst.msk [vmem:[%s411_s21] sm:$0x1] %vm705_vm9, %v704_v16  ;;  %p1011_p12 = pnand %p1010_p11, %p1198_p5  ;;  %p1016_p2 = por %p1015_p1, %p1014_p0 }
 0x16f   : > { %p1012_p13 = pneg %p1011_p12 }
 0x171   : > { %p1017_p3 = pnand %p1016_p2, %p1012_p13 }
 0x173   : > { %1020 = shalt.err (!%p1017_p3)
}
 0x174   : > { %932 = dma.vmem_to_hbm [thread:$0]  (%p1198_p5), %s740_s18, 16, %s742_s15, %s712_s22  }
 0x175   : > { %s1035_s16 = sshra.s32 %s755_s29, 4  ;;  %s1041_s23 = scalar_lea.hbm %s1406_s7, 2  ;;  %s1036_s16 = int_to_ptr.hbm [resolvable:$true] %s1035_s16 }
 0x176   : > { %s1037_s17 = scalar_lea.hbm %s1036_s16, 1  ;;  %p1042_p9 = scmp.lt.s32.totalorder %s1036_s16, %s1406_s7 }
 0x177   : > { %p1038_p4 = scmp.ne.s32.totalorder %s1036_s16, %s1037_s17  ;;  %p1043_p10 = scmp.lt.s32.totalorder %s1041_s23, %s1037_s17 }
 0x179   : > { %p1039_p7 = pnand %p1038_p4, %p1198_p5  ;;  %p1044_p11 = por %p1043_p10, %p1042_p9 }
 0x17b   : > { %p1040_p8 = pneg %p1039_p7 }
 0x17d   : > { %p1045_p12 = pnand %p1044_p11, %p1040_p8 }
 0x17f   : > { %1048 = shalt.err (!%p1045_p12)
}
 0x180   : > { %933 = dma.vmem_to_hbm [thread:$0]  (%p1198_p5), %s753_s20, 16, %s755_s29, %s712_s22  }
 0x181   : > { %s724_s15 = scalar_lea.hbm %s1404_s5, %s1179_s28  ;;  %s399_s20 = scalar_lea.vmem [#allocation2], %s1311_s19 }
 0x182   : > { %s726_s22 = sshll.u32 %s399_s20, 4  ;;  %s728_s13 = sshll.u32 %s724_s15, 4  ;;  %s727_s22 = int_to_ptr.vmem [resolvable:$true] %s726_s22  ;;  %s729_s13 = int_to_ptr.hbm [resolvable:$true] %s728_s13 }
 0x183   : > { %s708_s14 = scalar_lea.sflag [#allocation3], %s1311_s19  ;;  %s1063_s16 = sshra.s32 %s729_s13, 4  ;;  %s1064_s16 = int_to_ptr.hbm [resolvable:$true] %s1063_s16 }
 0x184   : > { %s1065_s17 = scalar_lea.hbm %s1064_s16, 1  ;;  %s1069_s0 = scalar_lea.hbm %s1404_s5, 2 }
 0x185   : > { %p1066_p13 = scmp.ne.s32.totalorder %s1064_s16, %s1065_s17  ;;  %p1070_p2 = scmp.lt.s32.totalorder %s1064_s16, %s1404_s5 }
 0x186   : > { %p1071_p3 = scmp.lt.s32.totalorder %s1069_s0, %s1065_s17 }
 0x187   : > { %p1067_p0 = pnand %p1066_p13, %p1198_p5 }
 0x188   : > { %p1072_p4 = por %p1071_p3, %p1070_p2 }
 0x189   : > { %p1068_p1 = pneg %p1067_p0 }
 0x18b   : > { %p1073_p7 = pnand %p1072_p4, %p1068_p1 }
 0x195   : > { %v554_v31 = vpop.xlane.xlu2 %553 }
 0x196   : > { %v561_v32 = vsub.f32 0.0, %v554_v31 }
 0x198   : > { %v573_v36 = vmul.f32 %v919_v17, %v561_v32 }
 0x19a   : > { %v560_v33 = vpop.xlane.xlu1 %559  ;;  %v576_v41 = vsel %vm512_vm2, %v573_v36, 0.0 }
 0x19b   : > { %v563_v34 = vsub.f32 0.0, %v560_v33 }
 0x19d   : > { %v557_v35 = vpop.xlane.xlu0 %556  ;;  %v575_v39 = vmul.f32 %v921_v19, %v563_v34 }
 0x19e   : > { %v562_v37 = vsub.f32 0.0, %v557_v35 }
 0x19f   : > { %v579_v46 = vsel %vm512_vm2, %v575_v39, 0.0 }
 0x1a0   : > { %v574_v40 = vmul.f32 %v920_v20, %v562_v37 }
 0x1a2   : > { %v577_v43 = vsel %vm512_vm2, %v574_v40, 0.0 }
 0x1a3   : > { %v578_v45 = vadd.f32 %v577_v43, %v576_v41 }
 0x1a5   : > { %v580_v47 = vadd.f32 %v579_v46, %v578_v45 }
 0x1a7   : > { %v581_v48 = vrot.slane %v580_v47, 4 }
 0x1a9   : > { %v582_v49 = vadd.f32 %v581_v48, %v580_v47 }
 0x1ab   : > { %v583_v50 = vrot.slane %v582_v49, 2 }
 0x1ad   : > { %v584_v51 = vadd.f32 %v583_v50, %v582_v49 }
 0x1af   : > { %v585_v52 = vrot.slane %v584_v51, 1 }
 0x1b1   : > { %v586_v53 = vadd.f32 %v585_v52, %v584_v51 }
 0x1b3   : > { %588 = vst.msk [vmem:[%s399_s20] sm:$0x1] %vm587_vm13, %v586_v53 }
 0x1b4   : > { %1076 = shalt.err (!%p1073_p7)
}
 0x1b5   : > { %931 = dma.vmem_to_hbm [thread:$0]  (%p1198_p5), %s727_s22, 16, %s729_s13, %s708_s14  }
 0x1b6 PF: > { %p947_p8 = scmp.ge.s32.totalorder %s1115_s27, 2  ;;  %s766_s19 = sand.u32 1, %s1103_s24  }
 0x1b7   : > { %s767_s9 = scalar_lea.sflag [#allocation3], %s766_s19 }
 0x1b8   : > { %p938_p9 = pnand %p947_p8, %p1202_p6 }
 0x1ba   : > { %p939_p10 = pneg %p938_p9 }
 0x1bc   : > { %1094 = dma.done.wait (%p939_p10), %s767_s9, 16  }
 0x1bd   : > { %1096 = vsyncadd (%p939_p10), %s767_s9, 4294967280  ;;  %s1412_s29 = sadd.s32 4294967294, %s1115_s27  }
 0x1be   : > { %s775_s18 = sand.u32 1, %s1412_s29  }
 0x1bf   : > { %s776_s15 = scalar_lea.sflag [#allocation5], %s775_s18 }
 0x1c0   : > { %1098 = dma.done.wait (%p939_p10), %s776_s15, 32  }
 0x1c1   : > { %1100 = vsyncadd (%p939_p10), %s776_s15, 4294967264  ;;  %p21_p5 = scmp.ge.s32.totalorder %s1183_s30, 4   ;;  %s1413_s24 = smov %s1107_s25 }
 0x1c2   : > { %s1414_s25 = smov %s1111_s26  ;;  %s1415_s26 = smov %s1196_s10 }
 0x1c3   : > { %s1416_s27 = smov %s1183_s30  ;;  %23 = sbr.rel (!%p21_p5) target bundleno = 7 (0x7), region = 119 }
 0x1c8   :  { %790 = vsyncpa [#allocation3], 1 }
 0x1c9   :  { %792 = vsyncpa [#allocation3 + $0x1], 1 }
 0x1ca   :  { %793 = vsyncpa [#allocation5], 1 }
 0x1cb   :  { %795 = vsyncpa [#allocation5 + $0x1], 1 }

</bundles_post_ra>
